<compile_context>
chip_gen: v6e
topology: v6e:2x2x1
jax: 0.10.0
libtpu: 0.0.40
codegen_flags: <defaults>
</compile_context>

<pallas_src>
import functools

import jax
import jax.numpy as jnp
from jax.experimental import pallas as pl
from jax.experimental.pallas import tpu as pltpu


def _double_conv1_kernel(x_ref, w_ref, sh_ref, w4_ref, b4_ref, o_ref, *, wp):
    # x_ref:  (1, Cin, Hp*Wp)    bf16  zero-padded image, spatially flattened
    # w_ref:  (3*Cout, 18*Cin)   bf16  block-diagonal im2col weights
    #                                  rows [0,2Cout): branches 1&2 (taps 0..8)
    #                                  rows [2Cout,3Cout): branch 3 (taps 9..17)
    # sh_ref: (3*Cout, 1)        f32   folded BN shift (+conv bias)
    # w4_ref: (Cout, 3*Cout)     bf16  conv4 (1x1) weights, transposed
    # b4_ref: (Cout, 1)          f32
    # o_ref:  (1, Cout, H*Wp)    f32   lane-dense slab (cols >= W cropped later)
    c_in = x_ref.shape[1]
    _, c_out, slab = o_ref.shape

    xflat = x_ref[0]                                   # (Cin, Hp*Wp) bf16

    # Stack the 18 shifted taps (each a contiguous lane slice of the flattened
    # padded image) into one (18*Cin, slab) MXU operand.  Taps 0..8 are the
    # pad=1/dil=1 window shared by branches 1 & 2; taps 9..17 are pad=2/dil=2.
    taps = []
    for base, dil in ((1, 1), (0, 2)):
        for ky in range(3):
            for kx in range(3):
                start = (base + ky * dil) * wp + (base + kx * dil)
                taps.append(xflat[:, start:start + slab][None])   # (1, Cin, slab)
    x_all = jnp.concatenate(taps, axis=0).reshape(18 * c_in, slab)  # bf16

    # All three conv branches + BN(eval) shift + ReLU in one matmul / one VPU pass.
    acts = jnp.maximum(
        jnp.dot(w_ref[...], x_all, preferred_element_type=jnp.float32)
        + sh_ref[...], 0.0)                            # (3*Cout, slab) f32

    # Fused channel-concat + 1x1 conv (conv4), accumulated in f32.
    out = (jnp.dot(w4_ref[...], acts.astype(jnp.bfloat16),
                   preferred_element_type=jnp.float32)
           + b4_ref[...])                              # (Cout, slab) f32
    o_ref[...] = out.reshape(1, c_out, slab)


def double_conv_1(x_nchw, params):
    """x_nchw: (N, Cin, H, W) float32 -> (N, Cout, H, W) float32."""
    N, C_in, H, W = x_nchw.shape
    C_out = params["w1"].shape[-1]
    eps = 1e-5
    Wp = W + 4          # 2-pixel halo left/right
    Hp = H + 5          # 2-pixel halo top, 3 bottom (last row only feeds cropped cols)
    slab = H * Wp       # per-image output slab; columns w >= W cropped below

    # Fold BN (eval) scale into conv weights; build (Cout, 9*Cin) im2col weights.
    def fold(w, b, bn):
        gamma, beta, mean, var = bn
        scale = gamma / jnp.sqrt(var + eps)                    # (Cout,)
        w_t = (w * scale).reshape(9 * C_in, C_out).T           # (Cout, 9*Cin)
        shift = (b - mean) * scale + beta                      # (Cout,)
        return w_t, shift

    w1t, sh1 = fold(params["w1"], params["b1"], params["bn1"])
    w2t, sh2 = fold(params["w2"], params["b2"], params["bn2"])
    w3t, sh3 = fold(params["w3"], params["b3"], params["bn3"])

    # Block-diagonal weight: branches 1&2 read taps 0..8, branch 3 reads 9..17.
    zeros12 = jnp.zeros((2 * C_out, 9 * C_in), jnp.float32)
    zeros3 = jnp.zeros((C_out, 9 * C_in), jnp.float32)
    w_all = jnp.concatenate(
        [jnp.concatenate([jnp.concatenate([w1t, w2t], axis=0), zeros12], axis=1),
         jnp.concatenate([zeros3, w3t], axis=1)],
        axis=0).astype(jnp.bfloat16)                           # (3*Cout, 18*Cin)
    sh_all = jnp.concatenate([sh1, sh2, sh3]).reshape(3 * C_out, 1).astype(jnp.float32)
    w4t = params["w4"].T.astype(jnp.bfloat16)                  # (Cout, 3*Cout)
    b4 = params["b4"].reshape(C_out, 1).astype(jnp.float32)

    # bf16 activations (half the HBM traffic); NCHW consumed directly (no
    # transpose passes).  Halo + flatten so every tap is a contiguous slice.
    x_pad = jnp.pad(x_nchw.astype(jnp.bfloat16),
                    ((0, 0), (0, 0), (2, 3), (2, 2))).reshape(N, C_in, Hp * Wp)

    def full2d(r, c):
        return pl.BlockSpec((r, c), lambda n: (0, 0))

    out = pl.pallas_call(
        functools.partial(_double_conv1_kernel, wp=Wp),
        out_shape=jax.ShapeDtypeStruct((N, C_out, slab), jnp.float32),
        grid=(N,),
        in_specs=[
            pl.BlockSpec((1, C_in, Hp * Wp), lambda n: (n, 0, 0)),
            full2d(3 * C_out, 18 * C_in),
            full2d(3 * C_out, 1),
            full2d(C_out, 3 * C_out),
            full2d(C_out, 1),
        ],
        out_specs=pl.BlockSpec((1, C_out, slab), lambda n: (n, 0, 0)),
        compiler_params=pltpu.CompilerParams(dimension_semantics=("parallel",)),
    )(x_pad, w_all, sh_all, w4t, b4)

    # (N, Cout, H*Wp) -> crop wrap-around columns -> NCHW (no transpose needed).
    return out.reshape(N, C_out, H, Wp)[:, :, :, :W]


def make_params(key, c_in, c_out):
    ks = jax.random.split(key, 16)

    def conv_w(k):  # HWIO
        return jax.random.normal(k, (3, 3, c_in, c_out), jnp.float32) * 0.1

    def bn(k):
        kg, kb, km, kv = jax.random.split(k, 4)
        gamma = 1.0 + 0.1 * jax.random.normal(kg, (c_out,), jnp.float32)
        beta = 0.1 * jax.random.normal(kb, (c_out,), jnp.float32)
        mean = 0.1 * jax.random.normal(km, (c_out,), jnp.float32)
        var = 1.0 + 0.1 * jnp.abs(jax.random.normal(kv, (c_out,), jnp.float32))
        return (gamma, beta, mean, var)

    return {
        "w1": conv_w(ks[0]), "b1": 0.1 * jax.random.normal(ks[1], (c_out,)),
        "w2": conv_w(ks[2]), "b2": 0.1 * jax.random.normal(ks[3], (c_out,)),
        "w3": conv_w(ks[4]), "b3": 0.1 * jax.random.normal(ks[5], (c_out,)),
        "bn1": bn(ks[6]), "bn2": bn(ks[7]), "bn3": bn(ks[8]),
        "w4": 0.1 * jax.random.normal(ks[9], (3 * c_out, c_out), jnp.float32),
        "b4": 0.1 * jax.random.normal(ks[10], (c_out,), jnp.float32),
    }


def reference(x_nchw, params):
    """Pure-JAX (XLA) reference with the same bf16 weight/activation
    quantization and f32 accumulation the kernel uses."""
    eps = 1e-5

    def q(a):  # quantize to bf16, compute in f32 (products exact, f32 accumulation)
        return a.astype(jnp.bfloat16).astype(jnp.float32)

    x = q(jnp.transpose(x_nchw, (0, 2, 3, 1)))  # NHWC

    def branch(w, b, bn, pad, dil):
        gamma, beta, mean, var = bn
        scale = gamma / jnp.sqrt(var + eps)
        y = jax.lax.conv_general_dilated(
            x, q(w * scale), window_strides=(1, 1),
            padding=((pad, pad), (pad, pad)), rhs_dilation=(dil, dil),
            dimension_numbers=("NHWC", "HWIO", "NHWC"))
        return jnp.maximum(y + (b - mean) * scale + beta, 0.0)

    y1 = branch(params["w1"], params["b1"], params["bn1"], 1, 1)
    y2 = branch(params["w2"], params["b2"], params["bn2"], 1, 1)
    y3 = branch(params["w3"], params["b3"], params["bn3"], 2, 2)
    cat = q(jnp.concatenate([y1, y2, y3], axis=-1))
    out = jnp.einsum("nhwc,cd->nhwd", cat, q(params["w4"])) + params["b4"]
    return jnp.transpose(out, (0, 3, 1, 2))  # back to NCHW


if __name__ == "__main__":
    N, C_IN, C_OUT, H, W = 2, 4, 8, 16, 16
    key = jax.random.PRNGKey(0)
    kx, kp = jax.random.split(key)
    x = jax.random.normal(kx, (N, C_IN, H, W), jnp.float32)
    params = make_params(kp, C_IN, C_OUT)

    out = jax.block_until_ready(jax.jit(double_conv_1)(x, params))
    ref = jax.block_until_ready(reference(x, params))

    assert out.shape == (N, C_OUT, H, W), out.shape
    max_err = float(jnp.max(jnp.abs(out - ref)))
    assert jnp.allclose(out, ref, rtol=5e-3, atol=5e-3), max_err
    print("KERNEL_OK")
</pallas_src>

<mosaic_0001>
module attributes {stable_mosaic.version = 11 : i64} {
  func.func @_double_conv1_kernel(%arg0: i32, %arg1: memref<1x4x420xbf16, #tpu.memory_space<vmem>>, %arg2: memref<24x72xbf16, #tpu.memory_space<vmem>>, %arg3: memref<24x1xf32, #tpu.memory_space<vmem>>, %arg4: memref<8x24xbf16, #tpu.memory_space<vmem>>, %arg5: memref<8x1xf32, #tpu.memory_space<vmem>>, %arg6: memref<1x8x320xf32, #tpu.memory_space<vmem>>) attributes {dimension_semantics = [#tpu.dimension_semantics<parallel>], iteration_bounds = array<i64: 2>, scalar_prefetch = 0 : i64, scratch_operands = 0 : i64, tpu.core_type = #tpu.core_type<tc>, window_params = [{transform_indices = @transform_0, window_bounds = array<i64: 1, 4, 420>}, {pipeline_mode = #tpu.pipeline_mode<synchronous>, transform_indices = @transform_1, window_bounds = array<i64: 24, 72>}, {pipeline_mode = #tpu.pipeline_mode<synchronous>, transform_indices = @transform_2, window_bounds = array<i64: 24, 1>}, {pipeline_mode = #tpu.pipeline_mode<synchronous>, transform_indices = @transform_3, window_bounds = array<i64: 8, 24>}, {pipeline_mode = #tpu.pipeline_mode<synchronous>, transform_indices = @transform_4, window_bounds = array<i64: 8, 1>}, {transform_indices = @transform_5, window_bounds = array<i64: 1, 8, 320>}]} {
    %c0 = arith.constant 0 : index
    %c0_0 = arith.constant 0 : index
    %c0_1 = arith.constant 0 : index
    %0 = vector.load %arg1[%c0, %c0_0, %c0_1] : memref<1x4x420xbf16, #tpu.memory_space<vmem>>, vector<1x4x420xbf16>
    %1 = vector.shape_cast %0 : vector<1x4x420xbf16> to vector<4x420xbf16>
    %2 = vector.extract_strided_slice %1 {offsets = [0, 21], sizes = [4, 320], strides = [1, 1]} : vector<4x420xbf16> to vector<4x320xbf16>
    %3 = vector.shape_cast %2 : vector<4x320xbf16> to vector<1x4x320xbf16>
    %4 = vector.extract_strided_slice %1 {offsets = [0, 22], sizes = [4, 320], strides = [1, 1]} : vector<4x420xbf16> to vector<4x320xbf16>
    %5 = vector.shape_cast %4 : vector<4x320xbf16> to vector<1x4x320xbf16>
    %6 = vector.extract_strided_slice %1 {offsets = [0, 23], sizes = [4, 320], strides = [1, 1]} : vector<4x420xbf16> to vector<4x320xbf16>
    %7 = vector.shape_cast %6 : vector<4x320xbf16> to vector<1x4x320xbf16>
    %8 = vector.extract_strided_slice %1 {offsets = [0, 41], sizes = [4, 320], strides = [1, 1]} : vector<4x420xbf16> to vector<4x320xbf16>
    %9 = vector.shape_cast %8 : vector<4x320xbf16> to vector<1x4x320xbf16>
    %10 = vector.extract_strided_slice %1 {offsets = [0, 42], sizes = [4, 320], strides = [1, 1]} : vector<4x420xbf16> to vector<4x320xbf16>
    %11 = vector.shape_cast %10 : vector<4x320xbf16> to vector<1x4x320xbf16>
    %12 = vector.extract_strided_slice %1 {offsets = [0, 43], sizes = [4, 320], strides = [1, 1]} : vector<4x420xbf16> to vector<4x320xbf16>
    %13 = vector.shape_cast %12 : vector<4x320xbf16> to vector<1x4x320xbf16>
    %14 = vector.extract_strided_slice %1 {offsets = [0, 61], sizes = [4, 320], strides = [1, 1]} : vector<4x420xbf16> to vector<4x320xbf16>
    %15 = vector.shape_cast %14 : vector<4x320xbf16> to vector<1x4x320xbf16>
    %16 = vector.extract_strided_slice %1 {offsets = [0, 62], sizes = [4, 320], strides = [1, 1]} : vector<4x420xbf16> to vector<4x320xbf16>
    %17 = vector.shape_cast %16 : vector<4x320xbf16> to vector<1x4x320xbf16>
    %18 = vector.extract_strided_slice %1 {offsets = [0, 63], sizes = [4, 320], strides = [1, 1]} : vector<4x420xbf16> to vector<4x320xbf16>
    %19 = vector.shape_cast %18 : vector<4x320xbf16> to vector<1x4x320xbf16>
    %20 = vector.extract_strided_slice %1 {offsets = [0, 0], sizes = [4, 320], strides = [1, 1]} : vector<4x420xbf16> to vector<4x320xbf16>
    %21 = vector.shape_cast %20 : vector<4x320xbf16> to vector<1x4x320xbf16>
    %22 = vector.extract_strided_slice %1 {offsets = [0, 2], sizes = [4, 320], strides = [1, 1]} : vector<4x420xbf16> to vector<4x320xbf16>
    %23 = vector.shape_cast %22 : vector<4x320xbf16> to vector<1x4x320xbf16>
    %24 = vector.extract_strided_slice %1 {offsets = [0, 4], sizes = [4, 320], strides = [1, 1]} : vector<4x420xbf16> to vector<4x320xbf16>
    %25 = vector.shape_cast %24 : vector<4x320xbf16> to vector<1x4x320xbf16>
    %26 = vector.extract_strided_slice %1 {offsets = [0, 40], sizes = [4, 320], strides = [1, 1]} : vector<4x420xbf16> to vector<4x320xbf16>
    %27 = vector.shape_cast %26 : vector<4x320xbf16> to vector<1x4x320xbf16>
    %28 = vector.extract_strided_slice %1 {offsets = [0, 42], sizes = [4, 320], strides = [1, 1]} : vector<4x420xbf16> to vector<4x320xbf16>
    %29 = vector.shape_cast %28 : vector<4x320xbf16> to vector<1x4x320xbf16>
    %30 = vector.extract_strided_slice %1 {offsets = [0, 44], sizes = [4, 320], strides = [1, 1]} : vector<4x420xbf16> to vector<4x320xbf16>
    %31 = vector.shape_cast %30 : vector<4x320xbf16> to vector<1x4x320xbf16>
    %32 = vector.extract_strided_slice %1 {offsets = [0, 80], sizes = [4, 320], strides = [1, 1]} : vector<4x420xbf16> to vector<4x320xbf16>
    %33 = vector.shape_cast %32 : vector<4x320xbf16> to vector<1x4x320xbf16>
    %34 = vector.extract_strided_slice %1 {offsets = [0, 82], sizes = [4, 320], strides = [1, 1]} : vector<4x420xbf16> to vector<4x320xbf16>
    %35 = vector.shape_cast %34 : vector<4x320xbf16> to vector<1x4x320xbf16>
    %36 = vector.extract_strided_slice %1 {offsets = [0, 84], sizes = [4, 320], strides = [1, 1]} : vector<4x420xbf16> to vector<4x320xbf16>
    %37 = vector.shape_cast %36 : vector<4x320xbf16> to vector<1x4x320xbf16>
    %38 = tpu.concatenate %3, %5, %7, %9, %11, %13, %15, %17, %19, %21, %23, %25, %27, %29, %31, %33 in 0 : vector<1x4x320xbf16>, vector<1x4x320xbf16>, vector<1x4x320xbf16>, vector<1x4x320xbf16>, vector<1x4x320xbf16>, vector<1x4x320xbf16>, vector<1x4x320xbf16>, vector<1x4x320xbf16>, vector<1x4x320xbf16>, vector<1x4x320xbf16>, vector<1x4x320xbf16>, vector<1x4x320xbf16>, vector<1x4x320xbf16>, vector<1x4x320xbf16>, vector<1x4x320xbf16>, vector<1x4x320xbf16> -> vector<16x4x320xbf16>
    %39 = tpu.concatenate %35, %37 in 0 : vector<1x4x320xbf16>, vector<1x4x320xbf16> -> vector<2x4x320xbf16>
    %40 = tpu.concatenate %38, %39 in 0 : vector<16x4x320xbf16>, vector<2x4x320xbf16> -> vector<18x4x320xbf16>
    %41 = vector.shape_cast %40 : vector<18x4x320xbf16> to vector<72x320xbf16>
    %c0_2 = arith.constant 0 : index
    %c0_3 = arith.constant 0 : index
    %42 = vector.load %arg2[%c0_2, %c0_3] : memref<24x72xbf16, #tpu.memory_space<vmem>>, vector<24x72xbf16>
    %cst = arith.constant dense<0.000000e+00> : vector<24x320xf32>
    %43 = tpu.matmul %42, %41, %cst {dimension_numbers = #tpu.dot_dimension_numbers<[1], [0], [0], [1], [0, 0, 1, 1], [], []>} : vector<24x72xbf16>, vector<72x320xbf16>, vector<24x320xf32> -> vector<24x320xf32>
    %c0_4 = arith.constant 0 : index
    %c0_5 = arith.constant 0 : index
    %44 = vector.load %arg3[%c0_4, %c0_5] : memref<24x1xf32, #tpu.memory_space<vmem>>, vector<24x1xf32>
    %45 = vector.broadcast %44 : vector<24x1xf32> to vector<24x320xf32>
    %46 = arith.addf %43, %45 : vector<24x320xf32>
    %cst_6 = arith.constant 0.000000e+00 : f32
    %47 = vector.broadcast %cst_6 : f32 to vector<24x320xf32>
    %48 = arith.maximumf %46, %47 : vector<24x320xf32>
    %c0_7 = arith.constant 0 : index
    %c0_8 = arith.constant 0 : index
    %49 = vector.load %arg4[%c0_7, %c0_8] : memref<8x24xbf16, #tpu.memory_space<vmem>>, vector<8x24xbf16>
    %50 = arith.truncf %48 : vector<24x320xf32> to vector<24x320xbf16>
    %cst_9 = arith.constant dense<0.000000e+00> : vector<8x320xf32>
    %51 = tpu.matmul %49, %50, %cst_9 {dimension_numbers = #tpu.dot_dimension_numbers<[1], [0], [0], [1], [0, 0, 1, 1], [], []>} : vector<8x24xbf16>, vector<24x320xbf16>, vector<8x320xf32> -> vector<8x320xf32>
    %c0_10 = arith.constant 0 : index
    %c0_11 = arith.constant 0 : index
    %52 = vector.load %arg5[%c0_10, %c0_11] : memref<8x1xf32, #tpu.memory_space<vmem>>, vector<8x1xf32>
    %53 = vector.broadcast %52 : vector<8x1xf32> to vector<8x320xf32>
    %54 = arith.addf %51, %53 : vector<8x320xf32>
    %55 = vector.shape_cast %54 : vector<8x320xf32> to vector<1x8x320xf32>
    %c0_12 = arith.constant 0 : index
    %c0_13 = arith.constant 0 : index
    %c0_14 = arith.constant 0 : index
    %56 = vector.load %arg6[%c0_12, %c0_13, %c0_14] : memref<1x8x320xf32, #tpu.memory_space<vmem>>, vector<1x8x320xf32>
    tpu.vector_store %arg6[%c0_12, %c0_13, %c0_14], %55 {strides = array<i32>} : memref<1x8x320xf32, #tpu.memory_space<vmem>>, vector<1x8x320xf32>,
    return
  }
  func.func @transform_0(%arg0: i32) -> (i32, i32, i32) {
    %c0_i32 = arith.constant 0 : i32
    %c0_i32_0 = arith.constant 0 : i32
    %c0_i32_1 = arith.constant 0 : i32
    return %arg0, %c0_i32, %c0_i32_0 : i32, i32, i32
  }
  func.func @transform_1(%arg0: i32) -> (i32, i32) {
    %c0_i32 = arith.constant 0 : i32
    %c0_i32_0 = arith.constant 0 : i32
    %c0_i32_1 = arith.constant 0 : i32
    return %c0_i32, %c0_i32_0 : i32, i32
  }
  func.func @transform_2(%arg0: i32) -> (i32, i32) {
    %c0_i32 = arith.constant 0 : i32
    %c0_i32_0 = arith.constant 0 : i32
    %c0_i32_1 = arith.constant 0 : i32
    return %c0_i32, %c0_i32_0 : i32, i32
  }
  func.func @transform_3(%arg0: i32) -> (i32, i32) {
    %c0_i32 = arith.constant 0 : i32
    %c0_i32_0 = arith.constant 0 : i32
    %c0_i32_1 = arith.constant 0 : i32
    return %c0_i32, %c0_i32_0 : i32, i32
  }
  func.func @transform_4(%arg0: i32) -> (i32, i32) {
    %c0_i32 = arith.constant 0 : i32
    %c0_i32_0 = arith.constant 0 : i32
    %c0_i32_1 = arith.constant 0 : i32
    return %c0_i32, %c0_i32_0 : i32, i32
  }
  func.func @transform_5(%arg0: i32) -> (i32, i32, i32) {
    %c0_i32 = arith.constant 0 : i32
    %c0_i32_0 = arith.constant 0 : i32
    %c0_i32_1 = arith.constant 0 : i32
    return %arg0, %c0_i32, %c0_i32_0 : i32, i32, i32
  }
}

</mosaic_0001>

<bundles_post_ra>
// kernel: double_conv_1.1
= control target key start
LH: loop header
LB: loop body
LE: loop exit
PB: predicated region body
PF: predicated region fallthrough
CT: control target
= control target key end

     0   :  { %s979_s18 = smov 0   ;;  %s1121_s0 = inlined_call_operand.vmem [shape: bf16[2,4,420], index: 0, kind: input, shape index: {}]   ;;  %s1122_s1 = inlined_call_operand.vmem [shape: bf16[24,72], index: 1, kind: input, shape index: {}]   ;;  %s1123_s2 = inlined_call_operand.vmem [shape: f32[24,1], index: 2, kind: input, shape index: {}]   ;;  %s1124_s3 = inlined_call_operand.vmem [shape: bf16[8,24], index: 3, kind: input, shape index: {}]   ;;  %s1125_s4 = inlined_call_operand.vmem [shape: f32[8,1], index: 4, kind: input, shape index: {}]   ;;  %s1126_s5 = inlined_call_operand.vmem [shape: f32[2,8,320], index: 5, kind: output, shape index: {}]  }
   0x1 LB: > { %s836_s19 = sadd.s32 4294967295, %s928_s18   ;;  %p840_p0 = scmp.ge.s32.totalorder %s928_s18, 1  ;;  %s928_s18 = sphi %s979_s18, %s15_s18  }
   0x2   : > { %p187_p1 = scmp.lt.s32.totalorder %s928_s18, 3 }
   0x4   : > { %p188_p2 = pnand %p840_p0, %p187_p1 }
   0x5   : > { %p215_p3 = scmp.lt.s32.totalorder (!%p188_p2), %s836_s19, 1  ;;  %s930_s24 = smov (!%p188_p2), 126  }
   0x6   : > { %191 = sbr.rel (%p188_p2) target bundleno = 814 (0x32e), region = 40  ;;  %s931_s25 = smov (!%p188_p2), 107  }
   0x7   : > { %s932_s26 = smov (!%p188_p2), 67   ;;  %s933_s27 = smov (!%p188_p2), 105  }
   0x8   : > { %s934_s28 = smov (!%p188_p2), 109   ;;  %s935_s29 = smov (!%p188_p2), 86  }
   0x9   : > { %s936_s30 = smov (!%p188_p2), 69   ;;  %s937_s6 = smov (!%p188_p2), 21  }
   0xa   : > { %s938_s7 = smov (!%p188_p2), 17   ;;  %s939_s8 = smov (!%p188_p2), 88  }
   0xb   : > { %s1128_s19 = smov (!%p215_p3, %s836_s19), 1  ;;  %s940_s9 = smov 127   ;;  %vm236_vm0 = vcmask 1031168   ;;  %v941_v6 = vmov 1983009808   ;;  %v343_v8 = vlaneseq  ;;  %vm246_vm1 = vcmask 875520  }
   0xc   : > { %s856_s20 = sshll.u32 %s1128_s19, 3  ;;  %v341_v7 = vunpack.c.l.s4 %v941_v6  ;;  %s942_s10 = smov 19   ;;  %vm286_vm2 = vcmask 891904   ;;  %vm291_vm3 = vcmask 859136   ;;  %vm296_vm4 = vcmask 564224  }
   0xd   : > { %s219_s23 = scalar_lea.vmem %s1121_s0, %s856_s20  ;;  %v344_v12 = vshrl.u32 %v343_v8, 7  ;;  %s943_s11 = smov 106   ;;  %vm266_vm5 = vcmask 703488   ;;  %vm271_vm6 = vcmask 171008   ;;  %vm304_vm7 = vcmask 547840  }
   0xe   : > { %v993_v0 = vld [vmem:[%s219_s23] sm:$0xff]  ;;  %v342_v11 = vunpack.c.0.s8 %v341_v7  ;;  %s944_s12 = smov 87   ;;  %s945_s13 = smov 108   ;;  %vm281_vm8 = vcmask 138240   ;;  %vm276_vm9 = vcmask 154624   ;;  %vm251_vm10 = vcmask 867328  }
   0xf   : > { %233 = vrot.lane.b32.xlu0 %v993_v0, %s930_s24  ;;  %243 = vrot.lane.b32.xlu1 %v993_v0, %s931_s25  ;;  %vm256_vm11 = vcmask 719872   ;;  %vm231_vm12 = vcmask 1039360   ;;  %vm261_vm13 = vcmask 711680   ;;  %vm241_vm14 = vcmask 883712  }
  0x10   : > { %v1015_v18 = vsub.s32 %v342_v11, %v344_v12  ;;  %vm545_vm15 = vcmask 588800  }
  0x13   : > { %298 = vrot.lane.b32.xlu0 %v993_v0, %s932_s26  ;;  %288 = vrot.lane.b32.xlu1 %v993_v0, %s933_s27 }
  0x17   : > { %283 = vrot.lane.b32.xlu0 %v993_v0, %s934_s28  ;;  %263 = vrot.lane.b32.xlu1 %v993_v0, %s935_s29 }
  0x1b   : > { %293 = vrot.lane.b32.xlu0 %v993_v0, %s936_s30  ;;  %s890_s30 = smul.u32 24, %s1128_s19 }
  0x1f   : > { %268 = vrot.lane.b32.xlu0 %v993_v0, %s937_s6 }
  0x23   : > { %278 = vrot.lane.b32.xlu0 %v993_v0, %s938_s7 }
  0x27   : > { %253 = vrot.lane.b32.xlu0 %v993_v0, %s939_s8  ;;  %s224_s8 = scalar_lea.vmem %s1126_s5, %s890_s30 }
  0x2b   : > { %228 = vrot.lane.b32.xlu0 %v993_v0, %s940_s9 }
  0x81   : > { %v234_v1 = vpop.permute.xlu0 %233  ;;  %v244_v2 = vpop.permute.xlu1 %243 }
  0x82   : > { %v235_v3 = vrot.slane %v234_v1, 2  ;;  %v245_v9 = vrot.slane %v244_v2, 2 }
  0x84   : > { %v1007_v4 = vsel %vm236_vm0, %v234_v1, %v235_v3  ;;  %v1012_v14 = vsel %vm246_vm1, %v244_v2, %v245_v9  ;;  %vm552_vm0 = vcmask 1043456  }
  0x85   : > { %300 = vrot.lane.b32.xlu1 %v1007_v4, %s932_s26  ;;  %v299_v5 = vpop.permute.xlu0 %298  ;;  %v289_v10 = vpop.permute.xlu1 %288 }
  0x86   : > { %v290_v16 = vrot.slane %v289_v10, 2  ;;  %v302_v39 = vrot.slane %v299_v5, 2 }
  0x88   : > { %v292_v22 = vsel %vm291_vm3, %v289_v10, %v290_v16  ;;  %v305_v46 = vsel %vm304_vm7, %v299_v5, %v302_v39  ;;  %vm779_vm3 = vcmask 523264  }
  0x89   : > { %273 = vrot.lane.b32.xlu1 %v993_v0, %s942_s10  ;;  %v284_v13 = vpop.permute.xlu0 %283  ;;  %v264_v35 = vpop.permute.xlu1 %263 }
  0x8a   : > { %v285_v15 = vrot.slane %v284_v13, 2  ;;  %v265_v37 = vrot.slane %v264_v35, 2 }
  0x8c   : > { %v287_v17 = vsel %vm286_vm2, %v284_v13, %v285_v15  ;;  %v267_v44 = vsel %vm266_vm5, %v264_v35, %v265_v37  ;;  %v946_v37 = vmov 0   ;;  %vm948_vm2 = vmmov 0  }
  0x8d   : > { %248 = vrot.lane.b32.xlu1 %v993_v0, %s943_s11  ;;  %v441_v19 = vcombine.low %v287_v17, %v1012_v14  ;;  %v442_v20 = vcombine.high %v287_v17, %v1012_v14  ;;  %v294_v21 = vpop.permute.xlu0 %293  ;;  %594 = vmatprep.mubr.bf16.mxu0 %v946_v37 }
  0x8e   : > { %v295_v23 = vrot.slane %v294_v21, 2  ;;  %918 = vset.pattern.permute.xlu1 %v946_v37  ;;  %919 = vset.pattern.permute.xlu0 %v946_v37 }
  0x8f   : > { %v451_v25 = vrot.slane %v441_v19, %v1015_v18  ;;  %v458_v26 = vrot.slane %v442_v20, %v1015_v18 }
  0x90   : > { %v297_v24 = vsel %vm296_vm4, %v294_v21, %v295_v23 }
  0x91   : > { %258 = vrot.lane.b32.xlu1 %v993_v0, %s944_s12  ;;  %v443_v27 = vcombine.low %v292_v22, %v297_v24  ;;  %v444_v28 = vcombine.high %v292_v22, %v297_v24  ;;  %v269_v34 = vpop.permute.xlu0 %268 }
  0x92   : > { %v270_v38 = vrot.slane %v269_v34, 6 }
  0x93   : > { %v465_v29 = vrot.slane %v443_v27, %v1015_v18  ;;  %v472_v30 = vrot.slane %v444_v28, %v1015_v18 }
  0x94   : > { %v272_v45 = vsel %vm271_vm6, %v270_v38, %v269_v34 }
  0x95   : > { %238 = vrot.lane.b32.xlu1 %v993_v0, %s945_s13  ;;  %v474_v31 = vcombine.high %v451_v25, %v465_v29  ;;  %v475_v32 = vcombine.low %v458_v26, %v472_v30  ;;  %v473_v33 = vcombine.low %v451_v25, %v465_v29  ;;  %v279_v36 = vpop.permute.xlu0 %278  ;;  %v407_v50 = vcombine.high %v267_v44, %v272_v45 }
  0x96   : > { %v280_v42 = vrot.slane %v279_v36, 6  ;;  %v406_v57 = vcombine.low %v267_v44, %v272_v45  ;;  %v311_v44 = vld [vmem:[%s1123_s2 + $0x8] sm:$0xff]  ;;  %v677_v45 = vld [vmem:[%s1125_s4] sm:$0xff] }
  0x97   : > { %515 = vrot.lane.b32.xlu0 %v475_v32, %s931_s25  ;;  %v423_v62 = vrot.slane %v407_v50, %v1015_v18 }
  0x98   : > { %v282_v52 = vsel %vm281_vm8, %v280_v42, %v279_v36  ;;  %v416_v8 = vrot.slane %v406_v57, %v1015_v18 }
  0x99   : > { %513 = vrot.lane.b32.xlu1 %v474_v31, %s931_s25  ;;  %v254_v43 = vpop.permute.xlu0 %253 }
  0x9a   : > { %v255_v1 = vrot.slane %v254_v43, 2 }
  0x9c   : > { %v257_v11 = vsel %vm256_vm11, %v254_v43, %v255_v1  ;;  %v312_v43 = vld [vmem:[%s1123_s2 + $0x10] sm:$0xff] }
  0x9d   : > { %511 = vrot.lane.b32.xlu1 %v473_v33, %s931_s25  ;;  %v229_v56 = vpop.permute.xlu0 %228 }
  0x9e   : > { %v230_v6 = vrot.slane %v229_v56, 2 }
  0xa0   : > { %v232_v16 = vsel %vm231_vm12, %v229_v56, %v230_v6 }
  0xa1   : > { %v336_v24 = vcombine.low %v993_v0, %v232_v16  ;;  %v337_v30 = vcombine.high %v993_v0, %v232_v16 }
  0xa3   : > { %v346_v36 = vrot.slane %v336_v24, %v1015_v18  ;;  %v353_v38 = vrot.slane %v337_v30, %v1015_v18 }
  0xf7   : > { %v301_v40 = vpop.permute.xlu1 %300 }
  0xf8   : > { %v303_v41 = vrot.slane %v301_v40, 2 }
  0xfa   : > { %v306_v47 = vsel %vm304_vm7, %v301_v40, %v303_v41 }
  0xfb   : > { %v476_v48 = vcombine.low %v305_v46, %v306_v47  ;;  %v274_v49 = vpop.permute.xlu1 %273  ;;  %v477_v53 = vcombine.high %v305_v46, %v306_v47 }
  0xfc   : > { %v275_v51 = vrot.slane %v274_v49, 6 }
  0xfd   : > { %v484_v54 = vrot.slane %v476_v48, %v1015_v18  ;;  %v491_v5 = vrot.slane %v477_v53, %v1015_v18 }
  0xfe   : > { %v277_v55 = vsel %vm276_vm9, %v275_v51, %v274_v49 }
  0xff   : > { %v408_v58 = vcombine.low %v277_v55, %v282_v52  ;;  %v409_v59 = vcombine.high %v277_v55, %v282_v52  ;;  %v249_v60 = vpop.permute.xlu1 %248  ;;  %517 = vrot.lane.b32.xlu0 %v484_v54, %s931_s25  ;;  %v492_v61 = vcombine.high %v484_v54, %v484_v54 }
 0x100   : > { %v250_v63 = vrot.slane %v249_v60, 2 }
 0x101   : > { %v430_v2 = vrot.slane %v408_v58, %v1015_v18  ;;  %v437_v3 = vrot.slane %v409_v59, %v1015_v18  ;;  %519 = vrot.lane.b32.xlu1 %v492_v61, %s931_s25 }
 0x102   : > { %v252_v7 = vsel %vm251_vm10, %v249_v60, %v250_v63 }
 0x103   : > { %v259_v9 = vpop.permute.xlu1 %258  ;;  %521 = vrot.lane.b32.xlu0 %v491_v5, %s931_s25  ;;  %v440_v10 = vcombine.low %v423_v62, %v437_v3  ;;  %v371_v13 = vcombine.low %v1012_v14, %v252_v7  ;;  %v439_v15 = vcombine.high %v416_v8, %v430_v2  ;;  %v372_v19 = vcombine.high %v1012_v14, %v252_v7  ;;  %v1050_v14 = vld [vmem:[%s1122_s1] sm:$0xff]  }
 0x104   : > { %v260_v12 = vrot.slane %v259_v9, 2  ;;  %v438_v28 = vcombine.low %v416_v8, %v430_v2  ;;  %877 = vmatprep.mubr.msk.bf16.mxu1 %vm545_vm15, %v1050_v14 }
 0x105   : > { %509 = vrot.lane.b32.xlu1 %v440_v10, %s931_s25  ;;  %v381_v25 = vrot.slane %v371_v13, %v1015_v18  ;;  %v388_v31 = vrot.slane %v372_v19, %v1015_v18 }
 0x106   : > { %v262_v17 = vsel %vm261_vm13, %v259_v9, %v260_v12  ;;  %v921_v9 = vld [vmem:[%s1122_s1 + $0x8] ss:$0 sps:$4 sm:$0xff]   ;;  %v947_v12 = vmov 0.0  }
 0x107   : > { %v373_v20 = vcombine.low %v257_v11, %v262_v17  ;;  %v374_v21 = vcombine.high %v257_v11, %v262_v17  ;;  %v239_v22 = vpop.permute.xlu1 %238  ;;  %507 = vrot.lane.b32.xlu0 %v439_v15, %s931_s25 }
 0x108   : > { %v240_v23 = vrot.slane %v239_v22, 2 }
 0x109   : > { %v395_v26 = vrot.slane %v373_v20, %v1015_v18  ;;  %v402_v27 = vrot.slane %v374_v21, %v1015_v18  ;;  %v516_v47 = vpop.permute.xlu0 %515 }
 0x10a   : > { %v242_v29 = vsel %vm241_vm14, %v239_v22, %v240_v23 }
 0x10b   : > { %v338_v32 = vcombine.low %v1007_v4, %v242_v29  ;;  %v339_v33 = vcombine.high %v1007_v4, %v242_v29  ;;  %505 = vrot.lane.b32.xlu0 %v438_v28, %s931_s25  ;;  %v404_v34 = vcombine.high %v381_v25, %v395_v26  ;;  %v405_v0 = vcombine.low %v388_v31, %v402_v27  ;;  %v514_v46 = vpop.permute.xlu1 %513 }
 0x10c   : > { %v403_v39 = vcombine.low %v381_v25, %v395_v26  ;;  %v530_v56 = vsel %vm246_vm1, %v514_v46, %v516_v47 }
 0x10d   : > { %v360_v35 = vrot.slane %v338_v32, %v1015_v18  ;;  %501 = vrot.lane.b32.xlu1 %v404_v34, %s931_s25  ;;  %v367_v4 = vrot.slane %v339_v33, %v1015_v18  ;;  %v310_v18 = vld [vmem:[%s1123_s2] sm:$0xff] }
 0x10f   : > { %503 = vrot.lane.b32.xlu0 %v405_v0, %s931_s25  ;;  %v369_v40 = vcombine.high %v346_v36, %v360_v35  ;;  %v370_v41 = vcombine.low %v353_v38, %v367_v4  ;;  %v368_v42 = vcombine.low %v346_v36, %v360_v35  ;;  %v512_v48 = vpop.permute.xlu1 %511 }
 0x110   : > { %v529_v59 = vsel %vm246_vm1, %v512_v48, %v514_v46 }
 0x111   : > { %499 = vrot.lane.b32.xlu1 %v403_v39, %s931_s25  ;;  %v670_v39 = vld [vmem:[%s1124_s3] sm:$0xf] }
 0x113   : > { %495 = vrot.lane.b32.xlu0 %v369_v40, %s931_s25 }
 0x115   : > { %497 = vrot.lane.b32.xlu1 %v370_v41, %s931_s25 }
 0x117   : > { %493 = vrot.lane.b32.xlu0 %v368_v42, %s931_s25 }
 0x119   : > { %325 = vperm.xlu1 %918, %v312_v43  }
 0x11b   : > { %315 = vperm.xlu0 %919, %v310_v18  }
 0x11d   : > { %320 = vperm.xlu1 %918, %v311_v44  }
 0x121   : > { %680 = vperm.xlu1 %918, %v677_v45  }
 0x171   : > { %v518_v49 = vpop.permute.xlu0 %517 }
 0x173   : > { %v520_v50 = vpop.permute.xlu1 %519 }
 0x174   : > { %v531_v51 = vsel %vm246_vm1, %v518_v49, %v520_v50 }
 0x175   : > { %v522_v52 = vpop.permute.xlu0 %521  ;;  %v554_v55 = vsel %vm552_vm0, %v531_v51, 0 }
 0x176   : > { %889 = vmatprep.subr.msk.bf16.mxu1 %vm552_vm0, %v522_v52  ;;  %v532_v53 = vsel %vm246_vm1, %v520_v50, %v522_v52  ;;  %v560_v54 = vsel %vm552_vm0, %v522_v52, 0 }
 0x177   : > { %846 = vmatprep.subr.msk.bf16.mxu0 %vm552_vm0, %v532_v53  ;;  %868 = vmatpush3.bf16.msra.mxu1 %v560_v54  ;;  %v510_v58 = vpop.permute.xlu1 %509 }
 0x178   : > { %569 = vmatpush1.bf16.msra.mxu0 %v554_v55  ;;  %869 = vmatprep.subr.bf16.mxu1 %v516_v47 }
 0x179   : > { %570 = vmatprep.subr.bf16.mxu0 %v530_v56  ;;  %v508_v57 = vpop.permute.xlu0 %507 }
 0x17a   : > { %v528_v60 = vsel %vm246_vm1, %v508_v57, %v510_v58 }
 0x17b   : > { %870 = vmatpush3.bf16.msra.mxu1 %v516_v47 }
 0x17c   : > { %571 = vmatpush1.bf16.msra.mxu0 %v529_v59  ;;  %871 = vmatprep.subr.bf16.mxu1 %v510_v58 }
 0x17d   : > { %572 = vmatprep.subr.bf16.mxu0 %v528_v60  ;;  %v506_v61 = vpop.permute.xlu0 %505 }
 0x17e   : > { %v527_v62 = vsel %vm246_vm1, %v506_v61, %v508_v57 }
 0x17f   : > { %v502_v63 = vpop.permute.xlu1 %501  ;;  %872 = vmatpush3.bf16.msra.mxu1 %v510_v58 }
 0x180   : > { %573 = vmatpush1.bf16.msra.mxu0 %v527_v62 }
 0x181   : > { %v504_v1 = vpop.permute.xlu0 %503 }
 0x182   : > { %873 = vmatprep.subr.bf16.mxu1 %v504_v1  ;;  %v526_v2 = vsel %vm246_vm1, %v502_v63, %v504_v1 }
 0x183   : > { %v500_v3 = vpop.permute.xlu1 %499  ;;  %574 = vmatprep.subr.bf16.mxu0 %v526_v2  ;;  %874 = vmatpush3.bf16.msra.mxu1 %v504_v1 }
 0x184   : > { %v525_v5 = vsel %vm246_vm1, %v500_v3, %v502_v63 }
 0x185   : > { %575 = vmatpush1.bf16.msra.mxu0 %v525_v5  ;;  %v496_v6 = vpop.permute.xlu0 %495 }
 0x187   : > { %v498_v7 = vpop.permute.xlu1 %497 }
 0x188   : > { %875 = vmatprep.subr.bf16.mxu1 %v498_v7  ;;  %v524_v8 = vsel %vm246_vm1, %v496_v6, %v498_v7 }
 0x189   : > { %576 = vmatprep.subr.bf16.mxu0 %v524_v8  ;;  %876 = vmatpush3.bf16.msra.mxu1 %v498_v7  ;;  %v494_v10 = vpop.permute.xlu0 %493 }
 0x18a   : > { %v523_v11 = vsel %vm246_vm1, %v494_v10, %v496_v6  ;;  %vm683_vm1 = vcmask 195584  }
 0x18b   : > { %577 = vmatpush1.bf16.msra.mxu0 %v523_v11 }
 0x18c   : > { %878 = vmatmul.mubr.msk.bf16.vlgmr.msra.gmra.mxu1 %vm545_vm15, %v921_v9  ;;  %881 = vmatprep.subr.bf16.mxu0 %v947_v12 }
 0x18d   : > { %728 = vmatprep.mubr.bf16.mxu1 %v946_v37 }
 0x18e   : > { %847 = vmatmul.mubr.msk.bf16.vlgmr.msra.gmra.mxu0 %vm545_vm15, %v1050_v14 }
 0x18f   : > { %604 = vmatprep.mubr.bf16.mxu0 %v946_v37 }
 0x194   : > { %v326_v13 = vpop.permute.xlu1 %325 }
 0x196   : > { %848 = vmatmul.mubr.msk.bf16.gmra.mxu0 %vm545_vm15, %v921_v9  ;;  %v316_v17 = vpop.permute.xlu0 %315 }
 0x197   : > { %885 = vmatprep.mubr.msk.bf16.mxu0 %vm948_vm2, %v947_v12 }
 0x198   : > { %v321_v21 = vpop.permute.xlu1 %320 }
 0x19c   : > { %v681_v53 = vpop.permute.xlu1 %680 }
 0x24c   : > { %v879_v15 = vpop.f32.mrf.mxu1 }
 0x24d   : > { %v656_v16 = vadd.f32 %v879_v15, %v326_v13 }
 0x24e   : > { %v596_v19 = vpop.f32.mrf.mxu0  ;;  %v647_v20 = vpop.f32.mrf.mxu1 }
 0x24f   : > { %v669_v22 = vmax.f32 %v656_v16, 0.0  ;;  %v648_v23 = vadd.f32 %v647_v20, %v316_v17  ;;  %v597_v44 = vadd.f32 %v596_v19, %v316_v17 }
 0x250   : > { %v598_v24 = vpop.f32.mrf.mxu0  ;;  %v880_v25 = vpop.f32.mrf.mxu1 }
 0x251   : > { %v676_v26 = vpack.c.bf16 %v669_v22, %v669_v22  ;;  %v663_v29 = vmax.f32 %v648_v23, 0.0  ;;  %v599_v37 = vadd.f32 %v598_v24, %v316_v17  ;;  %v661_v51 = vmax.f32 %v597_v44, 0.0 }
 0x252   : > { %v600_v27 = vpop.f32.mrf.mxu0  ;;  %v650_v28 = vpop.f32.mrf.mxu1 }
 0x253   : > { %v651_v30 = vadd.f32 %v650_v28, %v321_v21  ;;  %v694_v14 = vsel %vm552_vm0, %v676_v26, 0  ;;  %v601_v40 = vadd.f32 %v600_v27, %v321_v21  ;;  %v662_v46 = vmax.f32 %v599_v37, 0.0 }
 0x254   : > { %v602_v31 = vpop.f32.mrf.mxu0  ;;  %882 = vmatpush3.bf16.msra.mxu0 %v694_v14 }
 0x255   : > { %v666_v32 = vmax.f32 %v651_v30, 0.0  ;;  %883 = vmatprep.subr.bf16.mxu0 %v947_v12  ;;  %v603_v35 = vadd.f32 %v602_v31, %v321_v21  ;;  %v664_v48 = vmax.f32 %v601_v40, 0.0 }
 0x256   : > { %v606_v33 = vpop.f32.mrf.mxu0 }
 0x257   : > { %v673_v34 = vpack.c.bf16 %v666_v32, %v663_v29  ;;  %v607_v36 = vadd.f32 %v606_v33, %v326_v13  ;;  %v665_v42 = vmax.f32 %v603_v35, 0.0  ;;  %v671_v52 = vpack.c.bf16 %v664_v48, %v661_v51 }
 0x258   : > { %v608_v0 = vpop.f32.mrf.mxu0 }
 0x259   : > { %v667_v4 = vmax.f32 %v607_v36, 0.0  ;;  %v609_v38 = vadd.f32 %v608_v0, %v326_v13  ;;  %884 = vmatpush3.bf16.msra.mxu0 %v673_v34  ;;  %v672_v49 = vpack.c.bf16 %v665_v42, %v662_v46 }
 0x25a   : > { %v610_v41 = vpop.f32.mrf.mxu0 }
 0x25b   : > { %v674_v43 = vpack.c.bf16 %v667_v4, %v667_v4  ;;  %v668_v18 = vmax.f32 %v609_v38, 0.0 }
 0x25c   : > { %v611_v45 = vpop.f32.mrf.mxu0  ;;  %886 = vmatmul.mubr.msk.bf16.vlgmr.msra.gmra.mxu0 %vm683_vm1, %v670_v39 }
 0x25d   : > { %v675_v47 = vpack.c.bf16 %v668_v18, %v668_v18  ;;  %v688_v50 = vsel %vm552_vm0, %v674_v43, 0 }
 0x25f   : > { %851 = vmatprep.subr.msk.bf16.mxu1 %vm552_vm0, %v675_v47 }
 0x260   : > { %709 = vmatpush1.bf16.msra.mxu1 %v688_v50 }
 0x261   : > { %710 = vmatprep.subr.bf16.mxu1 %v672_v49 }
 0x264   : > { %711 = vmatpush1.bf16.msra.mxu1 %v671_v52 }
 0x267   : > { %852 = vmatmul.mubr.msk.bf16.vlgmr.msra.gmra.mxu1 %vm683_vm1, %v670_v39 }
 0x31c   : > { %v771_v54 = vpop.f32.mrf.mxu0 }
 0x31d   : > { %v772_v55 = vadd.f32 %v771_v54, %v681_v53 }
 0x31e   : > { %v887_v56 = vpop.f32.mrf.mxu0 }
 0x31f   : > { %780 = vst.msk [vmem:[%s224_s8 + $0x10] sm:$0xff] %vm779_vm3, %v772_v55 }
 0x320   : > { %v774_v57 = vpop.f32.mrf.mxu0 }
 0x322   : > { %v888_v58 = vpop.f32.mrf.mxu0 }
 0x327   : > { %v730_v59 = vpop.f32.mrf.mxu1 }
 0x328   : > { %v731_v60 = vadd.f32 %v730_v59, %v681_v53 }
 0x329   : > { %v732_v61 = vpop.f32.mrf.mxu1 }
 0x32a   : > { %777 = vst [vmem:[%s224_s8] sm:$0xff] %v731_v60  ;;  %v733_v62 = vadd.f32 %v732_v61, %v681_v53 }
 0x32b   : > { %v734_v63 = vpop.f32.mrf.mxu1 }
 0x32c   : > { %778 = vst [vmem:[%s224_s8 + $0x8] sm:$0xff] %v733_v62 }
 0x32d   : > { %v735_v1 = vpop.f32.mrf.mxu1 }
 0x32e PF: > { %s15_s18 = sadd.s32 1, %s928_s18  }
 0x32f   : > { %p12_p4 = scmp.ge.s32.totalorder %s15_s18, 4  }
 0x331   :  { %14 = sbr.rel (!%p12_p4) target bundleno = 1 (0x1), region = 70 }

</bundles_post_ra>
